<compile_context>
chip_gen: v6e
topology: v6e:2x2x1
jax: 0.10.0
libtpu: 0.0.40
codegen_flags: <defaults>
</compile_context>

<pallas_src>
import numpy as np
import jax
import jax.numpy as jnp
from jax import lax
from jax.experimental import pallas as pl
from jax.experimental.pallas import tpu as pltpu


def _round_up(x, m):
    return (x + m - 1) // m * m


# ----------------------------------------------------------------------------
# Cross-entropy (matches torch.nn.CrossEntropyLoss, optional class weights).
# Grid = (num_splits, tiles_per_split); rows tiled, weighted sums accumulated
# in VMEM scratch, partial sums emitted per split, final divide done in JAX.
# ----------------------------------------------------------------------------
def _make_ce_kernel(n_valid, tile_rows, tiles_per_split):
    def _ce_kernel(logits_ref, targets_ref, weights_ref, nll_ref, wsum_ref,
                   acc_nll, acc_w):
        s = pl.program_id(0)          # split (one per TensorCore on v7x)
        i = pl.program_id(1)          # row-tile within the split (reduction)

        @pl.when(i == 0)
        def _():
            acc_nll[...] = jnp.zeros_like(acc_nll)
            acc_w[...] = jnp.zeros_like(acc_w)

        logits = logits_ref[...].astype(jnp.float32)     # (T, C)
        tgt = targets_ref[...]                           # (T, 1) int32
        w_row = weights_ref[...].astype(jnp.float32)     # (1, C)
        t, c = logits.shape

        # Row validity computed once as (T,1); boundary / overhang tiles are
        # masked here -- no padded HBM copy of logits/targets is ever made.
        row0 = (s * tiles_per_split + i) * tile_rows
        rid = lax.broadcasted_iota(jnp.int32, (t, 1), 0) + row0
        valid = rid < n_valid                            # (T, 1) bool

        # Clamp garbage rows BEFORE exp so partial-block junk can't make NaN.
        logits = jnp.where(valid, logits, 0.0)

        m = jnp.max(logits, axis=-1, keepdims=True)
        lse = jnp.log(jnp.sum(jnp.exp(logits - m), axis=-1, keepdims=True)) + m

        col = lax.broadcasted_iota(jnp.int32, (t, c), 1)
        onehot = (col == tgt).astype(jnp.float32)                    # (T, C)
        picked = jnp.sum(onehot * logits, axis=-1, keepdims=True)    # (T, 1)
        w_i = jnp.sum(onehot * w_row, axis=-1, keepdims=True)        # (T, 1)
        w_i = jnp.where(valid, w_i, 0.0)

        acc_nll[...] += jnp.sum((lse - picked) * w_i, keepdims=True)
        acc_w[...] += jnp.sum(w_i, keepdims=True)

        @pl.when(i == pl.num_programs(1) - 1)
        def _():
            nll_ref[...] = acc_nll[...].reshape(nll_ref.shape)
            wsum_ref[...] = acc_w[...].reshape(wsum_ref.shape)

    return _ce_kernel


def cross_entropy_pallas(logits, targets, class_weights=None,
                         tile_rows=2048, num_splits=2):
    n, c = logits.shape
    tgt2 = targets.astype(jnp.int32).reshape(n, 1)
    if class_weights is None:
        w = jnp.ones((1, c), dtype=jnp.float32)
    else:
        w = jnp.asarray(class_weights, jnp.float32).reshape(1, c)

    # Large row tile (multiple of 8) to amortize the ~0.35us per-grid-step
    # overhead; capped so the lane-padded block stays around <= 4 MiB.
    c_pad = _round_up(c, 128)
    tn_budget = max(8, (4 * 1024 * 1024 // (c_pad * 4)) // 8 * 8)
    tn = max(8, min(tile_rows, tn_budget, _round_up(n, 8)))

    nblocks = pl.cdiv(n, tn)            # real data blocks -- NO pad copy
    num_splits = max(1, min(num_splits, nblocks))
    tpc = pl.cdiv(nblocks, num_splits)  # row tiles per split

    def block_idx(s, i):
        # Overhang iterations (s*tpc+i >= nblocks) re-read the last block; the
        # in-kernel row mask zeroes their contribution, so no OOB DMA, no pad.
        return jnp.minimum(s * tpc + i, nblocks - 1)

    blk_bytes = tn * c_pad * jnp.dtype(logits.dtype).itemsize
    vmem_limit = int(min(64 << 20, max(16 << 20, 3 * blk_bytes + (4 << 20))))

    nll_p, w_p = pl.pallas_call(
        _make_ce_kernel(n, tn, tpc),
        out_shape=(jax.ShapeDtypeStruct((num_splits, 1, 1), jnp.float32),
                   jax.ShapeDtypeStruct((num_splits, 1, 1), jnp.float32)),
        grid_spec=pltpu.PrefetchScalarGridSpec(
            num_scalar_prefetch=0,
            grid=(num_splits, tpc),
            in_specs=[pl.BlockSpec((tn, c), lambda s, i: (block_idx(s, i), 0)),
                      pl.BlockSpec((tn, 1), lambda s, i: (block_idx(s, i), 0)),
                      pl.BlockSpec((1, c), lambda s, i: (0, 0))],
            out_specs=(pl.BlockSpec((1, 1, 1), lambda s, i: (s, 0, 0)),
                       pl.BlockSpec((1, 1, 1), lambda s, i: (s, 0, 0))),
            scratch_shapes=[pltpu.VMEM((1, 1), jnp.float32),
                            pltpu.VMEM((1, 1), jnp.float32)]),
        compiler_params=pltpu.CompilerParams(
            dimension_semantics=("parallel", "arbitrary"),
            vmem_limit_bytes=vmem_limit),
    )(logits, tgt2, w)

    # Partial per-split sums; final (cheap) divide in JAX.
    return jnp.sum(nll_p) / jnp.sum(w_p)


# ----------------------------------------------------------------------------
# MSE (regression branch), tiled over rows with a VMEM scratch accumulator.
# ----------------------------------------------------------------------------
def _make_mse_kernel(n_valid, tile_rows):
    def _mse_kernel(pred_ref, y_ref, out_ref, acc):
        i = pl.program_id(0)

        @pl.when(i == 0)
        def _():
            acc[...] = jnp.zeros_like(acc)

        p = pred_ref[...].astype(jnp.float32)
        y = y_ref[...].astype(jnp.float32)
        t = p.shape[0]
        rid = lax.broadcasted_iota(jnp.int32, (t, 1), 0) + i * tile_rows
        valid = rid < n_valid
        d = p - y
        acc[...] += jnp.sum(jnp.where(valid, d * d, 0.0), keepdims=True)

        @pl.when(i == pl.num_programs(0) - 1)
        def _():
            out_ref[...] = acc[...]

    return _mse_kernel


def mse_pallas(pred, y, tile_rows=2048):
    pred2 = pred.reshape(pred.shape[0], -1)
    y2 = y.reshape(pred2.shape)
    n, f = pred2.shape

    f_pad = _round_up(f, 128)
    tn_budget = max(8, (4 * 1024 * 1024 // (f_pad * 4)) // 8 * 8)
    tn = max(8, min(tile_rows, tn_budget, _round_up(n, 8)))
    nblocks = pl.cdiv(n, tn)

    blk_bytes = tn * f_pad * jnp.dtype(pred2.dtype).itemsize
    vmem_limit = int(min(64 << 20, max(16 << 20, 5 * blk_bytes + (4 << 20))))

    out = pl.pallas_call(
        _make_mse_kernel(n, tn),
        out_shape=jax.ShapeDtypeStruct((1, 1), jnp.float32),
        grid_spec=pltpu.PrefetchScalarGridSpec(
            num_scalar_prefetch=0,
            grid=(nblocks,),
            in_specs=[pl.BlockSpec((tn, f), lambda i: (i, 0)),
                      pl.BlockSpec((tn, f), lambda i: (i, 0))],
            out_specs=pl.BlockSpec((1, 1), lambda i: (0, 0)),
            scratch_shapes=[pltpu.VMEM((1, 1), jnp.float32)]),
        compiler_params=pltpu.CompilerParams(
            dimension_semantics=("arbitrary",),
            vmem_limit_bytes=vmem_limit),
    )(pred2, y2)
    return out[0, 0] / (n * f)


# ----------------------------------------------------------------------------
# Fused encoding kernel: ClusteringLoss(high) + ClusteringLoss(low) +
# DistanceLoss(high, low) in ONE pallas_call, tiled over the sequence (M)
# axis.  Per-tile (B, tM, N) blocks; (B, N) / scalar / (B, M) accumulators in
# VMEM scratch; divisions / max / mean done in a pl.when(last) finalize.
# ----------------------------------------------------------------------------
def _make_fused_encoding_kernel(min_b, m_total, tile_m):
    def _kernel(hi_ref, lo_ref, cl_hi_ref, cl_lo_ref, dist_ref,
                dist_hi_acc, dist_lo_acc, sq_hi_acc, sq_lo_acc,
                sum_h_acc, sum_l_acc, d_store):
        i = pl.program_id(0)

        @pl.when(i == 0)
        def _():
            dist_hi_acc[...] = jnp.zeros_like(dist_hi_acc)
            dist_lo_acc[...] = jnp.zeros_like(dist_lo_acc)
            sq_hi_acc[...] = jnp.zeros_like(sq_hi_acc)
            sq_lo_acc[...] = jnp.zeros_like(sq_lo_acc)
            sum_h_acc[...] = jnp.zeros_like(sum_h_acc)
            sum_l_acc[...] = jnp.zeros_like(sum_l_acc)

        hi = hi_ref[...].astype(jnp.float32)           # (Bh, tM, N)
        lo = lo_ref[...].astype(jnp.float32)           # (Bl, tM, N)

        # Sequence (M) validity of this tile; last tile may be partial.
        m_pos = lax.broadcasted_iota(jnp.int32, (1, tile_m), 1) + i * tile_m
        mv2 = m_pos < m_total                          # (1, tM)
        mv3 = mv2[:, :, None]                          # (1, tM, 1)

        # ---- ClusteringLoss partial sums (each encoding, untrimmed batch) ---
        # NOTE: torch's discarded `x.mean(dim=-1)` no-op is intentionally
        # not reproduced.
        def cluster_partial(x, dist_acc, sq_acc):
            mean_b = jnp.mean(x, axis=0, keepdims=True)                  # (1,tM,N)
            dist_acc[...] += jnp.sum(jnp.where(mv3, (x - mean_b) ** 2, 0.0),
                                     axis=1)                             # (B, N)
            sq_acc[...] += jnp.sum(jnp.where(mv3, mean_b * mean_b, 0.0))

        cluster_partial(hi, dist_hi_acc, sq_hi_acc)
        cluster_partial(lo, dist_lo_acc, sq_lo_acc)

        # ---- DistanceLoss partials on the common (min_b) batch slice --------
        h = hi[:min_b]
        l = lo[:min_b]
        d_tile = jnp.sum((h - l) ** 2, axis=2)                           # (min_b,tM)
        # masked (zeroed) entries so the finalize max/sum need no extra mask
        d_store[i] = jnp.where(mv2, d_tile, 0.0)
        sum_h_acc[...] += jnp.sum(jnp.where(mv3, h, 0.0), axis=1)        # (min_b,N)
        sum_l_acc[...] += jnp.sum(jnp.where(mv3, l, 0.0), axis=1)

        @pl.when(i == pl.num_programs(0) - 1)
        def _():
            # Degenerate (all-zero) encodings give NaN/Inf, same as torch.
            def cluster_final(dist_acc, sq_acc):
                rel = dist_acc[...] / sq_acc[...]          # (B,N)/(1,1)
                return jnp.sum(rel) / rel.size / jnp.max(rel)

            cl_hi_ref[...] = jnp.full(
                (1, 1), cluster_final(dist_hi_acc, sq_hi_acc), cl_hi_ref.dtype)
            cl_lo_ref[...] = jnp.full(
                (1, 1), cluster_final(dist_lo_acc, sq_lo_acc), cl_lo_ref.dtype)

            inv_m = 1.0 / m_total
            mean_h = sum_h_acc[...] * inv_m                              # (min_b,N)
            mean_l = sum_l_acc[...] * inv_m
            denom = (jnp.sum(mean_h * mean_h, axis=1, keepdims=True)
                     + jnp.sum(mean_l * mean_l, axis=1, keepdims=True))  # (min_b,1)
            d_all = d_store[...]                                         # (nT,minb,tM)
            rel = d_all / denom[None, :, :]
            # rel >= 0 everywhere, so masked zeros never win the max.
            loss = jnp.sum(rel) / (min_b * m_total) / jnp.max(rel)
            dist_ref[...] = jnp.full((1, 1), loss, dist_ref.dtype)

    return _kernel


def clustering_and_distance_pallas(high_flat, low_flat, tile_m=256):
    bh, mh, nh = high_flat.shape
    bl, ml, nl = low_flat.shape
    assert mh == ml and nh == nl, "merge_encodings always yields matching (m, n)"
    m, n = mh, nh
    min_b = min(bh, bl)
    # TODO(synk): DistanceLoss's seq-length trim (min over dim 1) is a no-op
    # here because merge_encodings always produces the same m for both
    # encodings; only the batch trim (min_b) is applied.

    itemsize = max(jnp.dtype(high_flat.dtype).itemsize,
                   jnp.dtype(low_flat.dtype).itemsize)
    n_pad = _round_up(n, 128)

    tm = max(8, min(_round_up(tile_m, 8), _round_up(m, 8)))

    def in_buf_bytes(t):          # both inputs, double-buffered
        return 2 * (bh + bl) * t * n_pad * itemsize

    while tm > 8 and in_buf_bytes(tm) > (16 << 20):
        tm = max(8, _round_up(tm // 2, 8))

    nt = pl.cdiv(m, tm)

    # Shape-derived VMEM limit (no hard-coded 16 MiB): blocks + scratch +
    # headroom, clamped to stay valid on v5e/v6e/v7x.
    scratch_bytes = 4 * (n_pad * (_round_up(bh, 8) + _round_up(bl, 8)
                                  + 2 * _round_up(min_b, 8))
                         + nt * _round_up(min_b, 8) * _round_up(tm, 128)
                         + 4 * 8 * 128)
    vmem_limit = int(min(100 << 20,
                         max(32 << 20,
                             in_buf_bytes(tm) + scratch_bytes + (8 << 20))))

    outs = pl.pallas_call(
        _make_fused_encoding_kernel(min_b, m, tm),
        out_shape=(jax.ShapeDtypeStruct((1, 1), jnp.float32),
                   jax.ShapeDtypeStruct((1, 1), jnp.float32),
                   jax.ShapeDtypeStruct((1, 1), jnp.float32)),
        grid_spec=pltpu.PrefetchScalarGridSpec(
            num_scalar_prefetch=0,
            grid=(nt,),
            in_specs=[pl.BlockSpec((bh, tm, n), lambda i: (0, i, 0)),
                      pl.BlockSpec((bl, tm, n), lambda i: (0, i, 0))],
            out_specs=(pl.BlockSpec((1, 1), lambda i: (0, 0)),
                       pl.BlockSpec((1, 1), lambda i: (0, 0)),
                       pl.BlockSpec((1, 1), lambda i: (0, 0))),
            scratch_shapes=[pltpu.VMEM((bh, n), jnp.float32),
                            pltpu.VMEM((bl, n), jnp.float32),
                            pltpu.VMEM((1, 1), jnp.float32),
                            pltpu.VMEM((1, 1), jnp.float32),
                            pltpu.VMEM((min_b, n), jnp.float32),
                            pltpu.VMEM((min_b, n), jnp.float32),
                            pltpu.VMEM((nt, min_b, tm), jnp.float32)]),
        compiler_params=pltpu.CompilerParams(
            dimension_semantics=("arbitrary",),
            vmem_limit_bytes=vmem_limit),
    )(high_flat, low_flat)
    cl_hi, cl_lo, dl = (o[0, 0] for o in outs)
    return cl_hi + cl_lo, dl


# ----------------------------------------------------------------------------
# InterpretableLoss forward (glue in plain JAX / numpy, hot paths above)
# ----------------------------------------------------------------------------
class InterpretableLossPallas:
    def __init__(self, task_type='classify', class_weights=None, alpha_flag=False):
        if task_type not in ('classify', 'regression'):
            raise ValueError("task_type must be 'classify' or 'regression'")
        self.task_type = task_type
        self.class_weights = class_weights
        self.alpha = 0.0
        self.beta = 0.0
        self.gamma = 0.0
        self.alpha_flag = alpha_flag

    def _main_loss(self, logits, y):
        if self.task_type == 'classify':
            return cross_entropy_pallas(logits, y, self.class_weights)
        return mse_pallas(logits, y)

    def merge_encodings(self, encoding, mask_host):
        # jnp.reshape (C order) on a contiguous array matches torch's .view
        # element-for-element, so this reproduces the module's (unusual)
        # flatten/gather/reshape exactly.  The mask must be host-resident so
        # the gathered shape stays static (same constraint torch's .view has);
        # indices are computed once on host, gather runs on device.
        bs, seg, m, n = encoding.shape
        enc_flat = jnp.reshape(encoding, (bs * seg * n, m))
        idx = np.flatnonzero(np.asarray(mask_host).reshape(bs * seg * n)
                             ).astype(np.int32)
        selected = jnp.take(enc_flat, idx, axis=0)
        return jnp.reshape(selected, (-1, m, n))

    def forward(self, out, y, mask_flag=False):
        logits = out['high_attention_output']
        classification_loss = self._main_loss(logits, y)

        # torch: `if reg != 0: reg = reg / reg.max() * classification_loss.max()`
        # done branch-free on device; NaN-safe when reg == 0 (0/0 avoided).
        reg = jnp.asarray(out.get('regularization_loss', 0.0), jnp.float32)
        nonzero = jnp.any(reg != 0)
        safe_max = jnp.where(nonzero, jnp.max(reg), 1.0)
        adjusted = reg / safe_max * jnp.max(classification_loss)
        regularization_loss = jnp.where(nonzero, adjusted, reg)

        zero = jnp.zeros((), jnp.float32)
        if self.alpha == 0 and self.beta == 0:
            # early-return ordering matches the torch module exactly
            return (classification_loss, classification_loss, zero, zero,
                    regularization_loss)

        if ('high_attention_encoding' in out and 'low_attention_encoding' in out
                and out['high_attention_encoding'] is not None
                and out['low_attention_encoding'] is not None):
            mask = np.asarray(out['mask'])          # host mask, read once
            high_flat = self.merge_encodings(out['high_attention_encoding'], mask)
            low_flat = self.merge_encodings(out['low_attention_encoding'], ~mask)
            clustering_loss, distance_loss = clustering_and_distance_pallas(
                high_flat, low_flat)
        else:
            clustering_loss = zero
            distance_loss = zero

        total_loss = (classification_loss
                      + self.alpha * distance_loss
                      + self.beta * clustering_loss
                      + self.gamma * regularization_loss)
        # TODO(synk): torch's `requires_grad_()` / `grad_fn` checks are autograd
        # bookkeeping with no JAX forward-pass equivalent; omitted.
        return (total_loss, classification_loss, distance_loss,
                clustering_loss, regularization_loss)

    __call__ = forward


if __name__ == "__main__":
    key = jax.random.PRNGKey(0)
    k1, k2, k3, k4, k5 = jax.random.split(key, 5)

    # small shapes consistent with the module's forward
    N, C = 8, 16                      # batch of logits, num classes
    bs, seg, m, n = 2, 2, 16, 8       # encoding (bs, seg, m, n), mask (bs, seg, n)

    logits = jax.random.normal(k1, (N, C), dtype=jnp.float32)
    targets = jax.random.randint(k2, (N,), 0, C, dtype=jnp.int32)
    enc_hi = jax.random.normal(k3, (bs, seg, m, n), dtype=jnp.float32)
    enc_lo = jax.random.normal(k4, (bs, seg, m, n), dtype=jnp.float32)

    # deterministic mask; True-count (and its complement) divisible by n
    mask = np.zeros((bs, seg, n), dtype=bool)
    mask[:, :, : n // 2] = True

    out = {
        'high_attention_output': logits,
        'high_attention_encoding': enc_hi,
        'low_attention_encoding': enc_lo,
        'mask': mask,
        'regularization_loss': jnp.array(0.0, jnp.float32),
    }

    loss_mod = InterpretableLossPallas(task_type='classify',
                                       class_weights=None, alpha_flag=True)

    # 1) default state (alpha = beta = 0): early-return branch (CE kernel only)
    res_default = loss_mod(out, targets)
    jax.block_until_ready(res_default)

    # 2) simulate post-Pareto-update weights so the full path runs
    loss_mod.alpha, loss_mod.beta, loss_mod.gamma = 0.3, 0.2, 0.1
    res_full = loss_mod(out, targets)
    jax.block_until_ready(res_full)

    # ---- pure-JAX references ------------------------------------------------
    def ce_ref(lg, tg, cw=None):
        lg = lg.astype(jnp.float32)
        lse = jax.nn.logsumexp(lg, axis=-1)
        picked = jnp.take_along_axis(lg, tg[:, None], -1)[:, 0]
        nll = lse - picked
        if cw is None:
            return jnp.mean(nll)
        wi = cw[tg]
        return jnp.sum(nll * wi) / jnp.sum(wi)

    def clustering_ref(x):
        mean = jnp.mean(x, axis=0)
        d = jnp.sum((x - mean) ** 2, axis=1)
        rel = d / jnp.sum(mean ** 2)
        rel = rel / jnp.max(rel)
        return jnp.mean(rel)

    def distance_ref(h, l):
        mlen = min(h.shape[1], l.shape[1]); mb = min(h.shape[0], l.shape[0])
        h = h[:mb, :mlen]; l = l[:mb, :mlen]
        d = jnp.sum((h - l) ** 2, axis=2)
        mh = jnp.mean(h, axis=1); ml = jnp.mean(l, axis=1)
        rel = d / (jnp.sum(mh ** 2, axis=1, keepdims=True)
                   + jnp.sum(ml ** 2, axis=1, keepdims=True))
        rel = rel / jnp.max(rel)
        return jnp.mean(rel)

    hi_flat = loss_mod.merge_encodings(enc_hi, mask)
    lo_flat = loss_mod.merge_encodings(enc_lo, ~mask)
    total, ce, dl, cl, reg = res_full
    np.testing.assert_allclose(np.asarray(ce),
                               np.asarray(ce_ref(logits, targets)),
                               rtol=2e-4, atol=1e-6)
    np.testing.assert_allclose(np.asarray(cl),
                               np.asarray(clustering_ref(hi_flat)
                                          + clustering_ref(lo_flat)),
                               rtol=2e-4, atol=1e-6)
    np.testing.assert_allclose(np.asarray(dl),
                               np.asarray(distance_ref(hi_flat, lo_flat)),
                               rtol=2e-4, atol=1e-6)

    # 3) tiled CE path: grid > 1, 2-way split, boundary (non-multiple) rows,
    #    class weights
    big_logits = jax.random.normal(k1, (300, C), dtype=jnp.float32)
    big_targets = jax.random.randint(k2, (300,), 0, C, dtype=jnp.int32)
    cw = jnp.linspace(0.5, 1.5, C, dtype=jnp.float32)
    ce_big = cross_entropy_pallas(big_logits, big_targets, class_weights=cw,
                                  tile_rows=64)
    np.testing.assert_allclose(np.asarray(ce_big),
                               np.asarray(ce_ref(big_logits, big_targets, cw)),
                               rtol=2e-4, atol=1e-6)

    # 4) tiled fused encoding kernel: grid > 1, partial last M tile, Bh != Bl
    hi_t = jax.random.normal(k3, (3, 40, 8), dtype=jnp.float32)
    lo_t = jax.random.normal(k4, (2, 40, 8), dtype=jnp.float32)
    cl_p, dl_p = clustering_and_distance_pallas(hi_t, lo_t, tile_m=16)
    np.testing.assert_allclose(np.asarray(cl_p),
                               np.asarray(clustering_ref(hi_t)
                                          + clustering_ref(lo_t)),
                               rtol=2e-4, atol=1e-6)
    np.testing.assert_allclose(np.asarray(dl_p),
                               np.asarray(distance_ref(hi_t, lo_t)),
                               rtol=2e-4, atol=1e-6)

    # 5) tiled MSE (regression branch), boundary rows
    pred = jax.random.normal(k5, (37, 5), dtype=jnp.float32)
    ytgt = jax.random.normal(k2, (37, 5), dtype=jnp.float32)
    ms = mse_pallas(pred, ytgt)
    np.testing.assert_allclose(np.asarray(ms),
                               np.asarray(jnp.mean((pred - ytgt) ** 2)),
                               rtol=2e-4, atol=1e-6)

    jax.block_until_ready((ce_big, cl_p, dl_p, ms))
    print("KERNEL_OK")
</pallas_src>

<mosaic_0001>
module attributes {stable_mosaic.version = 11 : i64} {
  func.func @_ce_kernel(%arg0: i32, %arg1: i32, %arg2: memref<8x16xf32, #tpu.memory_space<vmem>>, %arg3: memref<8x1xi32, #tpu.memory_space<vmem>>, %arg4: memref<1x16xf32, #tpu.memory_space<vmem>>, %arg5: memref<1x1x1xf32, #tpu.memory_space<vmem>>, %arg6: memref<1x1x1xf32, #tpu.memory_space<vmem>>, %arg7: memref<1x1xf32, #tpu.memory_space<vmem>>, %arg8: memref<1x1xf32, #tpu.memory_space<vmem>>) attributes {dimension_semantics = [#tpu.dimension_semantics<parallel>, #tpu.dimension_semantics<arbitrary>], iteration_bounds = array<i64: 1, 1>, scalar_prefetch = 0 : i64, scratch_operands = 2 : i64, tpu.core_type = #tpu.core_type<tc>, window_params = [{transform_indices = @transform_0, window_bounds = array<i64: 8, 16>}, {transform_indices = @transform_1, window_bounds = array<i64: 8, 1>}, {pipeline_mode = #tpu.pipeline_mode<synchronous>, transform_indices = @transform_2, window_bounds = array<i64: 1, 16>}, {transform_indices = @transform_3, window_bounds = array<i64: 1, 1, 1>}, {transform_indices = @transform_4, window_bounds = array<i64: 1, 1, 1>}]} {
    %c0_i32 = arith.constant 0 : i32
    %0 = arith.cmpi eq, %arg1, %c0_i32 : i32
    %1 = arith.extui %0 : i1 to i32
    %c0_i32_0 = arith.constant 0 : i32
    %2 = arith.cmpi ne, %1, %c0_i32_0 : i32
    scf.if %2 {
      %cst_24 = arith.constant 0.000000e+00 : f32
      %62 = vector.broadcast %cst_24 : f32 to vector<1x1xf32>
      %c0_25 = arith.constant 0 : index
      %c0_26 = arith.constant 0 : index
      %63 = vector.load %arg7[%c0_25, %c0_26] : memref<1x1xf32, #tpu.memory_space<vmem>>, vector<1x1xf32>
      tpu.vector_store %arg7[%c0_25, %c0_26], %62 {strides = array<i32>} : memref<1x1xf32, #tpu.memory_space<vmem>>, vector<1x1xf32>,
      %cst_27 = arith.constant 0.000000e+00 : f32
      %64 = vector.broadcast %cst_27 : f32 to vector<1x1xf32>
      %c0_28 = arith.constant 0 : index
      %c0_29 = arith.constant 0 : index
      %65 = vector.load %arg8[%c0_28, %c0_29] : memref<1x1xf32, #tpu.memory_space<vmem>>, vector<1x1xf32>
      tpu.vector_store %arg8[%c0_28, %c0_29], %64 {strides = array<i32>} : memref<1x1xf32, #tpu.memory_space<vmem>>, vector<1x1xf32>,
    } else {
    }
    %c0 = arith.constant 0 : index
    %c0_1 = arith.constant 0 : index
    %3 = vector.load %arg2[%c0, %c0_1] : memref<8x16xf32, #tpu.memory_space<vmem>>, vector<8x16xf32>
    %c0_2 = arith.constant 0 : index
    %c0_3 = arith.constant 0 : index
    %4 = vector.load %arg3[%c0_2, %c0_3] : memref<8x1xi32, #tpu.memory_space<vmem>>, vector<8x1xi32>
    %c0_4 = arith.constant 0 : index
    %c0_5 = arith.constant 0 : index
    %5 = vector.load %arg4[%c0_4, %c0_5] : memref<1x16xf32, #tpu.memory_space<vmem>>, vector<1x16xf32>
    %c1_i32 = arith.constant 1 : i32
    %6 = arith.muli %arg0, %c1_i32 : i32
    %7 = arith.addi %6, %arg1 : i32
    %c8_i32 = arith.constant 8 : i32
    %8 = arith.muli %7, %c8_i32 : i32
    %9 = tpu.iota {dimensions = array<i32: 0>} : vector<8x1xi32>
    %10 = vector.broadcast %8 : i32 to vector<8x1xi32>
    %11 = arith.addi %9, %10 : vector<8x1xi32>
    %c8_i32_6 = arith.constant 8 : i32
    %12 = vector.broadcast %c8_i32_6 : i32 to vector<8x1xi32>
    %13 = arith.cmpi slt, %11, %12 : vector<8x1xi32>
    %cst = arith.constant 0.000000e+00 : f32
    %14 = vector.shape_cast %13 : vector<8x1xi1> to vector<8x1xi1>
    %15 = vector.broadcast %14 : vector<8x1xi1> to vector<8x16xi1>
    %16 = vector.broadcast %cst : f32 to vector<8x16xf32>
    %17 = arith.select %15, %3, %16 : vector<8x16xi1>, vector<8x16xf32>
    %cst_7 = arith.constant dense<0xFF800000> : vector<8xf32>
    %18 = vector.multi_reduction <maximumf>, %17, %cst_7 [1] : vector<8x16xf32> to vector<8xf32>
    %19 = vector.shape_cast %18 : vector<8xf32> to vector<8x1xf32>
    %20 = vector.broadcast %19 : vector<8x1xf32> to vector<8x16xf32>
    %21 = arith.subf %17, %20 : vector<8x16xf32>
    %22 = math.exp %21 : vector<8x16xf32>
    %cst_8 = arith.constant dense<0.000000e+00> : vector<8xf32>
    %23 = vector.multi_reduction <add>, %22, %cst_8 [1] : vector<8x16xf32> to vector<8xf32>
    %24 = vector.shape_cast %23 : vector<8xf32> to vector<8x1xf32>
    %25 = math.log %24 : vector<8x1xf32>
    %26 = arith.addf %25, %19 : vector<8x1xf32>
    %27 = tpu.iota {dimensions = array<i32: 1>} : vector<8x16xi32>
    %28 = vector.broadcast %4 : vector<8x1xi32> to vector<8x16xi32>
    %29 = arith.cmpi eq, %27, %28 : vector<8x16xi32>
    %30 = arith.extui %29 : vector<8x16xi1> to vector<8x16xi32>
    %31 = arith.sitofp %30 : vector<8x16xi32> to vector<8x16xf32>
    %32 = arith.mulf %31, %17 : vector<8x16xf32>
    %cst_9 = arith.constant dense<0.000000e+00> : vector<8xf32>
    %33 = vector.multi_reduction <add>, %32, %cst_9 [1] : vector<8x16xf32> to vector<8xf32>
    %34 = vector.shape_cast %33 : vector<8xf32> to vector<8x1xf32>
    %35 = vector.broadcast %5 : vector<1x16xf32> to vector<8x16xf32>
    %36 = arith.mulf %31, %35 : vector<8x16xf32>
    %cst_10 = arith.constant dense<0.000000e+00> : vector<8xf32>
    %37 = vector.multi_reduction <add>, %36, %cst_10 [1] : vector<8x16xf32> to vector<8xf32>
    %38 = vector.shape_cast %37 : vector<8xf32> to vector<8x1xf32>
    %cst_11 = arith.constant 0.000000e+00 : f32
    %39 = vector.broadcast %cst_11 : f32 to vector<8x1xf32>
    %40 = arith.select %13, %38, %39 : vector<8x1xi1>, vector<8x1xf32>
    %c0_12 = arith.constant 0 : index
    %c0_13 = arith.constant 0 : index
    %41 = vector.load %arg7[%c0_12, %c0_13] : memref<1x1xf32, #tpu.memory_space<vmem>>, vector<1x1xf32>
    %42 = arith.subf %26, %34 : vector<8x1xf32>
    %43 = arith.mulf %42, %40 : vector<8x1xf32>
    %44 = vector.shape_cast %43 : vector<8x1xf32> to vector<1x8x1xf32>
    %cst_14 = arith.constant dense<0.000000e+00> : vector<1xf32>
    %45 = vector.multi_reduction <add>, %44, %cst_14 [1, 2] : vector<1x8x1xf32> to vector<1xf32>
    %46 = vector.shape_cast %45 : vector<1xf32> to vector<1x1x1xf32>
    %47 = vector.extract %46[0, 0, 0] : f32 from vector<1x1x1xf32>
    %48 = vector.broadcast %47 : f32 to vector<1x1xf32>
    %49 = arith.addf %41, %48 : vector<1x1xf32>
    %c0_15 = arith.constant 0 : index
    %c0_16 = arith.constant 0 : index
    %50 = vector.load %arg7[%c0_15, %c0_16] : memref<1x1xf32, #tpu.memory_space<vmem>>, vector<1x1xf32>
    tpu.vector_store %arg7[%c0_15, %c0_16], %49 {strides = array<i32>} : memref<1x1xf32, #tpu.memory_space<vmem>>, vector<1x1xf32>,
    %c0_17 = arith.constant 0 : index
    %c0_18 = arith.constant 0 : index
    %51 = vector.load %arg8[%c0_17, %c0_18] : memref<1x1xf32, #tpu.memory_space<vmem>>, vector<1x1xf32>
    %52 = vector.shape_cast %40 : vector<8x1xf32> to vector<1x8x1xf32>
    %cst_19 = arith.constant dense<0.000000e+00> : vector<1xf32>
    %53 = vector.multi_reduction <add>, %52, %cst_19 [1, 2] : vector<1x8x1xf32> to vector<1xf32>
    %54 = vector.shape_cast %53 : vector<1xf32> to vector<1x1x1xf32>
    %55 = vector.extract %54[0, 0, 0] : f32 from vector<1x1x1xf32>
    %56 = vector.broadcast %55 : f32 to vector<1x1xf32>
    %57 = arith.addf %51, %56 : vector<1x1xf32>
    %c0_20 = arith.constant 0 : index
    %c0_21 = arith.constant 0 : index
    %58 = vector.load %arg8[%c0_20, %c0_21] : memref<1x1xf32, #tpu.memory_space<vmem>>, vector<1x1xf32>
    tpu.vector_store %arg8[%c0_20, %c0_21], %57 {strides = array<i32>} : memref<1x1xf32, #tpu.memory_space<vmem>>, vector<1x1xf32>,
    %c0_i32_22 = arith.constant 0 : i32
    %59 = arith.cmpi eq, %arg1, %c0_i32_22 : i32
    %60 = arith.extui %59 : i1 to i32
    %c0_i32_23 = arith.constant 0 : i32
    %61 = arith.cmpi ne, %60, %c0_i32_23 : i32
    scf.if %61 {
      %c0_24 = arith.constant 0 : index
      %c0_25 = arith.constant 0 : index
      %62 = vector.load %arg7[%c0_24, %c0_25] : memref<1x1xf32, #tpu.memory_space<vmem>>, vector<1x1xf32>
      %63 = vector.shape_cast %62 : vector<1x1xf32> to vector<1x1x1xf32>
      %c0_26 = arith.constant 0 : index
      %c0_27 = arith.constant 0 : index
      %c0_28 = arith.constant 0 : index
      %64 = vector.load %arg5[%c0_26, %c0_27, %c0_28] : memref<1x1x1xf32, #tpu.memory_space<vmem>>, vector<1x1x1xf32>
      tpu.vector_store %arg5[%c0_26, %c0_27, %c0_28], %63 {strides = array<i32>} : memref<1x1x1xf32, #tpu.memory_space<vmem>>, vector<1x1x1xf32>,
      %c0_29 = arith.constant 0 : index
      %c0_30 = arith.constant 0 : index
      %65 = vector.load %arg8[%c0_29, %c0_30] : memref<1x1xf32, #tpu.memory_space<vmem>>, vector<1x1xf32>
      %66 = vector.shape_cast %65 : vector<1x1xf32> to vector<1x1x1xf32>
      %c0_31 = arith.constant 0 : index
      %c0_32 = arith.constant 0 : index
      %c0_33 = arith.constant 0 : index
      %67 = vector.load %arg6[%c0_31, %c0_32, %c0_33] : memref<1x1x1xf32, #tpu.memory_space<vmem>>, vector<1x1x1xf32>
      tpu.vector_store %arg6[%c0_31, %c0_32, %c0_33], %66 {strides = array<i32>} : memref<1x1x1xf32, #tpu.memory_space<vmem>>, vector<1x1x1xf32>,
    } else {
    }
    return
  }
  func.func @transform_0(%arg0: i32, %arg1: i32) -> (i32, i32) {
    %c1_i32 = arith.constant 1 : i32
    %0 = arith.muli %arg0, %c1_i32 : i32
    %1 = arith.addi %0, %arg1 : i32
    %c0_i32 = arith.constant 0 : i32
    %2 = arith.minsi %1, %c0_i32 : i32
    %c0_i32_0 = arith.constant 0 : i32
    %c0_i32_1 = arith.constant 0 : i32
    return %2, %c0_i32_0 : i32, i32
  }
  func.func @transform_1(%arg0: i32, %arg1: i32) -> (i32, i32) {
    %c1_i32 = arith.constant 1 : i32
    %0 = arith.muli %arg0, %c1_i32 : i32
    %1 = arith.addi %0, %arg1 : i32
    %c0_i32 = arith.constant 0 : i32
    %2 = arith.minsi %1, %c0_i32 : i32
    %c0_i32_0 = arith.constant 0 : i32
    %c0_i32_1 = arith.constant 0 : i32
    return %2, %c0_i32_0 : i32, i32
  }
  func.func @transform_2(%arg0: i32, %arg1: i32) -> (i32, i32) {
    %c0_i32 = arith.constant 0 : i32
    %c0_i32_0 = arith.constant 0 : i32
    %c0_i32_1 = arith.constant 0 : i32
    return %c0_i32, %c0_i32_0 : i32, i32
  }
  func.func @transform_3(%arg0: i32, %arg1: i32) -> (i32, i32, i32) {
    %c0_i32 = arith.constant 0 : i32
    %c0_i32_0 = arith.constant 0 : i32
    %c0_i32_1 = arith.constant 0 : i32
    return %arg0, %c0_i32, %c0_i32_0 : i32, i32, i32
  }
  func.func @transform_4(%arg0: i32, %arg1: i32) -> (i32, i32, i32) {
    %c0_i32 = arith.constant 0 : i32
    %c0_i32_0 = arith.constant 0 : i32
    %c0_i32_1 = arith.constant 0 : i32
    return %arg0, %c0_i32, %c0_i32_0 : i32, i32, i32
  }
}

</mosaic_0001>

<bundles_post_ra>
// kernel: tpu_custom_call.1
= control target key start
LH: loop header
LB: loop body
LE: loop exit
PB: predicated region body
PF: predicated region fallthrough
CT: control target
= control target key end

     0   :  { %10 = vsyncpa [#allocation5], 0  ;;  %vm92_vm0 = vcmask 130048   ;;  %s320_s0 = inlined_call_operand.vmem [shape: f32[8,16], index: 0, kind: input, shape index: {}]   ;;  %s321_s1 = inlined_call_operand.vmem [shape: s32[8,1], index: 1, kind: input, shape index: {}]   ;;  %s322_s2 = inlined_call_operand.vmem [shape: f32[1,16], index: 2, kind: input, shape index: {}]   ;;  %s323_s3 = inlined_call_operand.hbm [shape: f32[1,1,1], index: 3, kind: output, shape index: {0}]   ;;  %s324_s4 = inlined_call_operand.hbm [shape: f32[1,1,1], index: 4, kind: output, shape index: {1}]  }
   0x1   :  { %v79_v0 = vld [vmem:[%s320_s0] sm:$0xff] }
   0x2   :  { %11 = vsyncpa [#allocation7], 0  ;;  %v93_v1 = vsel %vm92_vm0, %v79_v0, -inf  ;;  %v266_v2 = vmov 0   ;;  %v80_v3 = vld [vmem:[%s321_s1] sm:$0xff]  ;;  %vm76_vm1 = vcmask 0   ;;  %v105_v8 = vlaneseq }
   0x3   :  { %217 = vset.pattern.permute.xlu0 %v266_v2  ;;  %v267_v4 = vmov 0.0   ;;  %v208_v14 = vld [vmem:[%s322_s2] ss:$0 sm:$0xff]  ;;  %vm131_vm3 = vcmask 7168   ;;  %s268_s20 = smov [#allocation4]   ;;  %s269_s22 = smov [#allocation6]  }
   0x4   :  { %94 = vmax.xlane.f32.xlu0 %v93_v1  ;;  %77 = vst.msk [vmem:[#allocation2] sm:$0x1] %vm76_vm1, %v267_v4  ;;  %78 = vst.msk [vmem:[#allocation3] sm:$0x1] %vm76_vm1, %v267_v4  ;;  %v106_v9 = vand.u32 127, %v105_v8  ;;  %s173_s21 = sshll.u32 %s268_s20, 4  ;;  %s174_s21 = int_to_ptr.vmem [resolvable:$true] %s173_s21 }
   0x5   :  { %s183_s23 = sshll.u32 %s269_s22, 4  ;;  %s222_s24 = scalar_lea.vmem %s174_s21, 16  ;;  %s184_s23 = int_to_ptr.vmem [resolvable:$true] %s183_s23 }
   0x6   :  { %p223_p0 = scmp.ne.s32.totalorder %s174_s21, %s222_s24  ;;  %s226_s25 = scalar_lea.vmem %s174_s21, 32 }
   0x7   :  { %p227_p1 = scmp.lt.s32.totalorder %s174_s21, %s174_s21  ;;  %p228_p2 = scmp.lt.s32.totalorder %s226_s25, %s222_s24 }
   0x9   :  { %p229_p3 = por %p228_p2, %p227_p1 }
   0xb   :  { %v128_v43 = vld [vmem:[#allocation2] sm:$0x1]  ;;  %v146_v46 = vld [vmem:[#allocation3] sm:$0x1]  ;;  %p230_p4 = pnand %p229_p3, %p223_p0 }
  0x1a   :  { %108 = vperm.xlu0 %217, %v80_v3  }
  0x8d   :  { %v95_v5 = vpop.xlane.xlu0 %94 }
  0x8e   :  { %v96_v6 = vsub.f32 %v79_v0, %v95_v5 }
  0x90   :  { %v97_v7 = vmul.f32 1.442695, %v96_v6 }
  0x92   :  { %218 = vpow2.f32 %v97_v7 }
  0x95   :  { %v109_v10 = vpop.permute.xlu0 %108 }
  0x96   :  { %vm110_vm2 = vcmp.eq.s32.totalorder %v106_v9, %v109_v10 }
  0x97   :  { %v207_v11 = vsel %vm110_vm2, 1.0, %v267_v4 }
  0x98   :  { %v113_v12 = vmul.f32 %v207_v11, %v79_v0  ;;  %v123_v17 = vmul.f32 %v208_v14, %v207_v11 }
  0x9a   :  { %v114_v16 = vsel %vm92_vm0, %v113_v12, 0.0  ;;  %v124_v18 = vsel %vm92_vm0, %v123_v17, 0.0 }
  0x9f   :  { %v219_v13 = vpop.eup %218 }
  0xa0   :  { %v99_v15 = vsel %vm92_vm0, %v219_v13, 0.0 }
  0xa1   :  { %100 = vadd.xlane.f32.xlu1 %v99_v15 }
  0xa5   :  { %115 = vadd.xlane.f32.xlu1 %v114_v16 }
  0xa9   :  { %125 = vadd.xlane.f32.xlu1 %v124_v18 }
 0x12a   :  { %v101_v19 = vpop.xlane.xlu1 %100 }
 0x12b   :  { %220 = vlog2.f32 %v101_v19 }
 0x12e   :  { %v116_v21 = vpop.xlane.xlu1 %115 }
 0x132   :  { %v126_v25 = vpop.xlane.xlu1 %125 }
 0x133   :  { %v147_v28 = vsel %vm131_vm3, %v126_v25, 0.0 }
 0x138   :  { %v221_v20 = vpop.eup %220 }
 0x139   :  { %v103_v22 = vmul.f32 0.6931472, %v221_v20 }
 0x13b   :  { %v104_v23 = vadd.f32 %v103_v22, %v95_v5 }
 0x13d   :  { %v129_v24 = vsub.f32 %v104_v23, %v116_v21 }
 0x13f   :  { %v130_v26 = vmul.f32 %v129_v24, %v126_v25 }
 0x141   :  { %v132_v27 = vsel %vm131_vm3, %v130_v26, 0.0 }
 0x142   :  { %133 = vadd.xlane.f32.xlu1 %v132_v27 }
 0x146   :  { %148 = vadd.xlane.f32.xlu1 %v147_v28 }
 0x1cb   :  { %v134_v29 = vpop.xlane.xlu1 %133 }
 0x1cc   :  { %v135_v30 = vrot.slane %v134_v29, 4 }
 0x1ce   :  { %v136_v31 = vadd.f32 %v135_v30, %v134_v29 }
 0x1cf   :  { %v149_v32 = vpop.xlane.xlu1 %148 }
 0x1d0   :  { %v137_v33 = vrot.slane %v136_v31, 2  ;;  %v150_v34 = vrot.slane %v149_v32, 4 }
 0x1d2   :  { %v151_v35 = vadd.f32 %v150_v34, %v149_v32  ;;  %v138_v36 = vadd.f32 %v137_v33, %v136_v31 }
 0x1d4   :  { %v152_v37 = vrot.slane %v151_v35, 2  ;;  %v139_v38 = vrot.slane %v138_v36, 1 }
 0x1d6   :  { %v153_v39 = vadd.f32 %v152_v37, %v151_v35  ;;  %v140_v40 = vadd.f32 %v139_v38, %v138_v36 }
 0x1d8   :  { %209 = vpush %v140_v40  ;;  %v154_v41 = vrot.slane %v153_v39, 1 }
 0x1da   :  { %v155_v42 = vadd.f32 %v154_v41, %v153_v39 }
 0x1dc   :  { %211 = vpush %v155_v42 }
 0x209   :  { %s210_s2 = spop %209 }
 0x20a   :  { %v142_v44 = vstv %s210_s2 }
 0x20b   :  { %v143_v45 = vadd.f32 %v142_v44, %v128_v43 }
 0x20d   :  { %145 = vst.msk [vmem:[#allocation2] sm:$0x1] %vm76_vm1, %v143_v45  ;;  %s212_s19 = spop %211 }
 0x20e   :  { %v157_v47 = vstv %s212_s19 }
 0x20f   :  { %v158_v48 = vadd.f32 %v157_v47, %v146_v46 }
 0x211   :  { %159 = vst.msk [vmem:[#allocation3] sm:$0x1] %vm76_vm1, %v158_v48 }
 0x214   :  { %v163_v49 = vld [vmem:[#allocation2] sm:$0x1] }
 0x215   :  { %164 = vst.msk [vmem:[#allocation4] sm:$0x1] %vm76_vm1, %v163_v49 }
 0x216   :  { %233 = shalt.err (!%p230_p4)
}
 0x217   :  { %176 = dma.vmem_to_hbm [thread:$0]  %s174_s21, 16, %s323_s3, [#allocation5]  }
 0x218   :  { %v165_v50 = vld [vmem:[#allocation3] sm:$0x1]  ;;  %s242_s28 = scalar_lea.vmem %s184_s23, 16  ;;  %s246_s29 = scalar_lea.vmem %s184_s23, 32 }
 0x219   :  { %166 = vst.msk [vmem:[#allocation6] sm:$0x1] %vm76_vm1, %v165_v50  ;;  %p243_p5 = scmp.ne.s32.totalorder %s184_s23, %s242_s28  ;;  %p247_p6 = scmp.lt.s32.totalorder %s184_s23, %s184_s23 }
 0x21a   :  { %p248_p7 = scmp.lt.s32.totalorder %s246_s29, %s242_s28 }
 0x21c   :  { %p249_p8 = por %p248_p7, %p247_p6 }
 0x21e   :  { %p250_p9 = pnand %p249_p8, %p243_p5 }
 0x220   :  { %253 = shalt.err (!%p250_p9)
}
 0x221   :  { %186 = dma.vmem_to_hbm [thread:$0]  %s184_s23, 16, %s324_s4, [#allocation7]  }
 0x222   :  { %262 = dma.done.wait [#allocation5], 16  }
 0x223   :  { %263 = vsyncadd [#allocation5], 4294967280 }
 0x224   :  { %264 = dma.done.wait [#allocation7], 16  }
 0x225   :  { %265 = vsyncadd [#allocation7], 4294967280 }
 0x226   :  { %193 = vsyncpa [#allocation5], 1 }
 0x227   :  { %194 = vsyncpa [#allocation7], 1 }

</bundles_post_ra>
